<compile_context>
chip_gen: v5e
topology: v5e:2x2
jax: 0.10.0
libtpu: 0.0.40
codegen_flags: <defaults>
</compile_context>

<pallas_src>
import jax
import jax.numpy as jnp
from jax import lax
from jax.experimental import pallas as pl
from jax.experimental.pallas import tpu as pltpu


def self_attn1d2_kernel(x_ref, w_ref, b_ref, gamma_ref, o_ref, fgh_scr):
    """Grid = (batch steps, k tiles). x block is (bt, C, N); out block (bt, C, Tk)."""
    bt, C, N = x_ref.shape
    rows = fgh_scr.shape[1] - 1          # 2*och + C  (scratch has +1 ones-row)
    och = (rows - C) // 2
    Tk = o_ref.shape[2]

    k = pl.program_id(1)
    gamma = gamma_ref[0, 0]              # scalar from SMEM (sreg path)

    # ---- once per batch step (k == 0): fused 1x1 conv f/g/h for all bi ----
    @pl.when(k == 0)
    def _():
        w = w_ref[...]                                        # (rows, C) bf16
        b_full = jnp.broadcast_to(b_ref[...], (rows, N))      # hoisted out of bi loop
        ones_row = jnp.ones((1, N), jnp.float32)

        def conv_body(bi, carry):
            xb_bf = x_ref[bi].astype(jnp.bfloat16)            # (C, N)
            # Single MXU push for all three 1x1 convs.
            fgh = jnp.dot(w, xb_bf, preferred_element_type=jnp.float32) + b_full
            fgh_scr[bi, pl.ds(0, rows), :] = fgh              # rows: [f; g; h]
            fgh_scr[bi, pl.ds(rows, 1), :] = ones_row         # ones-row -> column sums
            return carry

        lax.fori_loop(0, bt, conv_body, 0, unroll=True)

    # ---- per (batch step, k-tile): softmax over j + attention on (N, Tk) ----
    koff = pl.multiple_of(k * Tk, Tk)

    def body(bi, carry):
        f = fgh_scr[bi, pl.ds(0, och), :].astype(jnp.bfloat16)                    # (och, N)
        g_k = fgh_scr[bi, pl.ds(och, och), pl.ds(koff, Tk)].astype(jnp.bfloat16)  # (och, Tk)
        h_aug = fgh_scr[bi, pl.ds(2 * och, C + 1), :].astype(jnp.bfloat16)        # (C+1, N)

        # fg[j, kk] = sum_i f[i, j] * g[i, kk]   (einsum 'aij,aik->ajk' per batch)
        fg = lax.dot_general(f, g_k, (((0,), (0,)), ((), ())),
                             preferred_element_type=jnp.float32)                  # (N, Tk) f32

        # Softmax over dim=-2 (rows j); j is fully resident -> plain max/exp in f32
        # (v5e has no bf16 VPU/EUP).
        fg = fg - jnp.max(fg, axis=0, keepdims=True)
        e = jnp.exp(fg).astype(jnp.bfloat16)                                      # (N, Tk)

        # One MXU dot yields both the un-normalized attention (rows 0..C-1) and
        # the softmax denominator (last row, from the ones-row) — same bf16 `e`.
        out_aug = jnp.dot(h_aug, e, preferred_element_type=jnp.float32)           # (C+1, Tk)
        attn_un = out_aug[0:C]                                                    # (C, Tk)
        s = out_aug[C:C + 1]                                                      # (1, Tk)

        # gamma folded into the EUP approximate reciprocal (free slot).
        scale = gamma * pl.reciprocal(s, approx=True)                             # (1, Tk)
        o_ref[bi] = attn_un * scale + x_ref[bi, :, pl.ds(koff, Tk)]
        return carry

    lax.fori_loop(0, bt, body, 0, unroll=True)


def _pick_batch_tile(B, max_bt=8, min_steps=4):
    """Largest divisor of B <= max_bt that still leaves >= min_steps grid steps
    (keeps the 'parallel' batch axis shardable across TensorCores and preserves
    DMA/compute overlap for small B)."""
    if B < min_steps:
        return 1
    target = max(1, min(max_bt, B // min_steps))
    for bt in range(target, 0, -1):
        if B % bt == 0:
            return bt
    return 1


def _pick_k_tile(N, max_tk=512):
    """Largest multiple of 128 dividing N, capped at max_tk; full N otherwise."""
    if N % 128 != 0:
        return N
    for tk in (max_tk, 256, 128):
        if tk <= max_tk and N % tk == 0:
            return tk
    return 128


def _vmem_bytes(bt, C, N, Tk, rows):
    """Rough per-step VMEM working-set estimate (double-buffered slabs + scratch
    + live intermediates)."""
    slabs = 2 * bt * C * N * 4 + 2 * bt * C * Tk * 4          # x in / o out, x2 buffers
    weights = 2 * (rows * C * 2 + rows * 4)                   # bf16 w + f32 b
    scratch = bt * (rows + 1) * N * 4                         # f32 fgh + ones row
    inter = N * Tk * (4 + 2) + (C + 1) * Tk * 4 + (rows + 1) * N * 4  # fg, e, out_aug, conv tmp
    return slabs + weights + scratch + inter


def self_attn1d2(x, wf, bf, wg, bg, wh, bh, gamma, *, max_batch_tile=8, max_k_tile=512):
    B, C, N = x.shape
    och = wf.shape[0]
    rows = 2 * och + C

    bt = _pick_batch_tile(B, max_batch_tile)
    Tk = _pick_k_tile(N, max_k_tile)

    # Shrink the batch tile if the working set would exceed a v7x-safe budget
    # (64 MiB physical there vs 128 MiB on v5e/v6e).
    budget = 44 * 1024 * 1024
    while bt > 1 and _vmem_bytes(bt, C, N, Tk, rows) > budget:
        bt = next(d for d in range(bt - 1, 0, -1) if B % d == 0)

    vmem_limit = int(min(max(int(1.5 * _vmem_bytes(bt, C, N, Tk, rows)) + (4 << 20),
                             16 << 20), 64 << 20))

    # Fuse the three conv weights/biases into single matmul operands (one-time,
    # wrapper-side XLA ops). Weights to bf16 for the MXU; biases stay f32.
    w_all = jnp.concatenate([wf, wg, wh], axis=0).astype(jnp.bfloat16)                # (rows, C)
    b_all = jnp.concatenate([bf, bg, bh], axis=0).astype(jnp.float32).reshape(rows, 1)
    gamma_arr = jnp.asarray(gamma, jnp.float32).reshape(1, 1)

    cost = pl.CostEstimate(
        flops=2 * B * (rows * C * N + och * N * N + (C + 1) * N * N),
        transcendentals=B * N * N,
        bytes_accessed=2 * B * C * N * 4 + rows * C * 2 + rows * 4 + 4,
    )

    return pl.pallas_call(
        self_attn1d2_kernel,
        out_shape=jax.ShapeDtypeStruct((B, C, N), jnp.float32),
        grid=(B // bt, N // Tk),
        in_specs=[
            pl.BlockSpec((bt, C, N), lambda i, k: (i, 0, 0)),        # x slab (full N, reused over k)
            pl.BlockSpec((rows, C), lambda i, k: (0, 0)),            # fused conv weight
            pl.BlockSpec((rows, 1), lambda i, k: (0, 0)),            # fused conv bias
            pl.BlockSpec(memory_space=pltpu.MemorySpace.SMEM),       # gamma scalar
        ],
        out_specs=pl.BlockSpec((bt, C, Tk), lambda i, k: (i, 0, k)),
        scratch_shapes=[pltpu.VMEM((bt, rows + 1, N), jnp.float32)], # [f; g; h; ones]
        compiler_params=pltpu.CompilerParams(
            dimension_semantics=("parallel", "arbitrary"),
            vmem_limit_bytes=vmem_limit),
        cost_estimate=cost,
    )(x, w_all, b_all, gamma_arr)


def ref_forward(x, wf, bf, wg, bg, wh, bh, gamma):
    """Pure-JAX f32 reference mirroring the PyTorch forward."""
    f = jnp.einsum('oc,bcn->bon', wf, x) + bf[None, :, None]
    g = jnp.einsum('oc,bcn->bon', wg, x) + bg[None, :, None]
    h = jnp.einsum('oc,bcn->bon', wh, x) + bh[None, :, None]
    fg = jnp.einsum('bij,bik->bjk', f, g)
    sm = jax.nn.softmax(fg, axis=-2)
    attn = jnp.einsum('bcj,bjk->bck', h, sm)
    return gamma * attn + x


if __name__ == "__main__":
    # Small shapes consistent with the module: ch=64 -> och = ch // 8 = 8.
    B, C, N = 2, 64, 128
    OCH = max(1, C // 8)

    key = jax.random.PRNGKey(0)
    kx, kwf, kbf, kwg, kbg, kwh, kbh = jax.random.split(key, 7)

    x  = jax.random.normal(kx,  (B, C, N), dtype=jnp.float32)
    wf = jax.random.normal(kwf, (OCH, C),  dtype=jnp.float32) * 0.1
    bf = jax.random.normal(kbf, (OCH,),    dtype=jnp.float32) * 0.1
    wg = jax.random.normal(kwg, (OCH, C),  dtype=jnp.float32) * 0.1
    bg = jax.random.normal(kbg, (OCH,),    dtype=jnp.float32) * 0.1
    wh = jax.random.normal(kwh, (C, C),    dtype=jnp.float32) * 0.1
    bh = jax.random.normal(kbh, (C,),      dtype=jnp.float32) * 0.1
    # Module __init__ sets gamma = 0 (output would equal x); use a deterministic
    # nonzero value so the attention path is actually exercised.
    gamma = jnp.float32(0.5)

    out = self_attn1d2(x, wf, bf, wg, bg, wh, bh, gamma)
    out = jax.block_until_ready(out)

    ref = ref_forward(x, wf, bf, wg, bg, wh, bh, gamma)
    assert out.shape == (B, C, N)
    # bf16 MXU operands + EUP approximate reciprocal -> loose tolerance.
    assert jnp.allclose(out, ref, rtol=5e-2, atol=5e-2), "mismatch vs JAX reference"

    print("KERNEL_OK")
</pallas_src>

<mosaic_0001>
module attributes {stable_mosaic.version = 11 : i64} {
  func.func @self_attn1d2_kernel(%arg0: i32, %arg1: i32, %arg2: memref<1x64x128xf32, #tpu.memory_space<vmem>>, %arg3: memref<80x64xbf16, #tpu.memory_space<vmem>>, %arg4: memref<80x1xf32, #tpu.memory_space<vmem>>, %arg5: memref<1x1xf32, #tpu.memory_space<smem>>, %arg6: memref<1x64x128xf32, #tpu.memory_space<vmem>>, %arg7: memref<1x81x128xf32, #tpu.memory_space<vmem>>) attributes {dimension_semantics = [#tpu.dimension_semantics<parallel>, #tpu.dimension_semantics<arbitrary>], iteration_bounds = array<i64: 2, 1>, scalar_prefetch = 0 : i64, scratch_operands = 1 : i64, tpu.core_type = #tpu.core_type<tc>, window_params = [{transform_indices = @transform_0, window_bounds = array<i64: 1, 64, 128>}, {pipeline_mode = #tpu.pipeline_mode<synchronous>, transform_indices = @transform_1, window_bounds = array<i64: 80, 64>}, {pipeline_mode = #tpu.pipeline_mode<synchronous>, transform_indices = @transform_2, window_bounds = array<i64: 80, 1>}, {transform_indices = @transform_3, window_bounds = array<i64: 1, 1>}, {transform_indices = @transform_4, window_bounds = array<i64: 1, 64, 128>}]} {
    %c0 = arith.constant 0 : index
    %c0_0 = arith.constant 0 : index
    %0 = memref.load %arg5[%c0, %c0_0] : memref<1x1xf32, #tpu.memory_space<smem>>
    %c0_i32 = arith.constant 0 : i32
    %1 = arith.cmpi eq, %arg1, %c0_i32 : i32
    %2 = arith.extui %1 : i1 to i32
    %c0_i32_1 = arith.constant 0 : i32
    %3 = arith.cmpi ne, %2, %c0_i32_1 : i32
    scf.if %3 {
      %c0_11 = arith.constant 0 : index
      %c0_12 = arith.constant 0 : index
      %43 = vector.load %arg3[%c0_11, %c0_12] : memref<80x64xbf16, #tpu.memory_space<vmem>>, vector<80x64xbf16>
      %c0_13 = arith.constant 0 : index
      %c0_14 = arith.constant 0 : index
      %44 = vector.load %arg4[%c0_13, %c0_14] : memref<80x1xf32, #tpu.memory_space<vmem>>, vector<80x1xf32>
      %45 = vector.shape_cast %44 : vector<80x1xf32> to vector<80x1xf32>
      %46 = vector.broadcast %45 : vector<80x1xf32> to vector<80x128xf32>
      %cst_15 = arith.constant 1.000000e+00 : f32
      %47 = vector.broadcast %cst_15 : f32 to vector<1x128xf32>
      %c0_i32_16 = arith.constant 0 : i32
      %48 = arith.index_cast %c0_i32_16 : i32 to index
      %c0_17 = arith.constant 0 : index
      %c0_18 = arith.constant 0 : index
      %49 = vector.load %arg2[%48, %c0_17, %c0_18] : memref<1x64x128xf32, #tpu.memory_space<vmem>>, vector<1x64x128xf32>
      %50 = vector.shape_cast %49 : vector<1x64x128xf32> to vector<64x128xf32>
      %51 = arith.truncf %50 : vector<64x128xf32> to vector<64x128xbf16>
      %cst_19 = arith.constant dense<0.000000e+00> : vector<80x128xf32>
      %52 = tpu.matmul %43, %51, %cst_19 {dimension_numbers = #tpu.dot_dimension_numbers<[1], [0], [0], [1], [0, 0, 1, 1], [], []>} : vector<80x64xbf16>, vector<64x128xbf16>, vector<80x128xf32> -> vector<80x128xf32>
      %53 = arith.addf %52, %46 : vector<80x128xf32>
      %54 = arith.index_cast %c0_i32_16 : i32 to index
      %c0_20 = arith.constant 0 : index
      %c0_21 = arith.constant 0 : index
      %55 = vector.load %arg7[%54, %c0_20, %c0_21] : memref<1x81x128xf32, #tpu.memory_space<vmem>>, vector<1x80x128xf32>
      %56 = vector.shape_cast %55 : vector<1x80x128xf32> to vector<80x128xf32>
      %57 = vector.shape_cast %53 : vector<80x128xf32> to vector<1x80x128xf32>
      tpu.vector_store %arg7[%54, %c0_20, %c0_21], %57 {strides = array<i32>} : memref<1x81x128xf32, #tpu.memory_space<vmem>>, vector<1x80x128xf32>,
      %58 = arith.index_cast %c0_i32_16 : i32 to index
      %c80 = arith.constant 80 : index
      %c0_22 = arith.constant 0 : index
      %59 = vector.load %arg7[%58, %c80, %c0_22] : memref<1x81x128xf32, #tpu.memory_space<vmem>>, vector<1x1x128xf32>
      %60 = vector.shape_cast %59 : vector<1x1x128xf32> to vector<1x128xf32>
      %61 = vector.shape_cast %47 : vector<1x128xf32> to vector<1x1x128xf32>
      tpu.vector_store %arg7[%58, %c80, %c0_22], %61 {strides = array<i32>} : memref<1x81x128xf32, #tpu.memory_space<vmem>>, vector<1x1x128xf32>,
      %c1_i32_23 = arith.constant 1 : i32
    } else {
    }
    %c128_i32 = arith.constant 128 : i32
    %4 = arith.muli %arg1, %c128_i32 : i32
    %5 = tpu.assume_multiple %4, 128 : i32
    %c0_i32_2 = arith.constant 0 : i32
    %6 = arith.index_cast %c0_i32_2 : i32 to index
    %c0_3 = arith.constant 0 : index
    %c0_4 = arith.constant 0 : index
    %7 = vector.load %arg7[%6, %c0_3, %c0_4] : memref<1x81x128xf32, #tpu.memory_space<vmem>>, vector<1x8x128xf32>
    %8 = vector.shape_cast %7 : vector<1x8x128xf32> to vector<8x128xf32>
    %9 = arith.truncf %8 : vector<8x128xf32> to vector<8x128xbf16>
    %10 = arith.index_cast %c0_i32_2 : i32 to index
    %c8 = arith.constant 8 : index
    %11 = arith.index_cast %5 : i32 to index
    %12 = vector.load %arg7[%10, %c8, %11] : memref<1x81x128xf32, #tpu.memory_space<vmem>>, vector<1x8x128xf32>
    %13 = vector.shape_cast %12 : vector<1x8x128xf32> to vector<8x128xf32>
    %14 = arith.truncf %13 : vector<8x128xf32> to vector<8x128xbf16>
    %15 = arith.index_cast %c0_i32_2 : i32 to index
    %c16 = arith.constant 16 : index
    %c0_5 = arith.constant 0 : index
    %16 = vector.load %arg7[%15, %c16, %c0_5] : memref<1x81x128xf32, #tpu.memory_space<vmem>>, vector<1x65x128xf32>
    %17 = vector.shape_cast %16 : vector<1x65x128xf32> to vector<65x128xf32>
    %18 = arith.truncf %17 : vector<65x128xf32> to vector<65x128xbf16>
    %cst = arith.constant dense<0.000000e+00> : vector<128x128xf32>
    %19 = tpu.matmul %9, %14, %cst {dimension_numbers = #tpu.dot_dimension_numbers<[0], [0], [1], [1], [0, 1, 1, 1], [], []>} : vector<8x128xbf16>, vector<8x128xbf16>, vector<128x128xf32> -> vector<128x128xf32>
    %cst_6 = arith.constant dense<0xFF800000> : vector<128xf32>
    %20 = vector.multi_reduction <maximumf>, %19, %cst_6 [0] : vector<128x128xf32> to vector<128xf32>
    %21 = vector.shape_cast %20 : vector<128xf32> to vector<1x128xf32>
    %22 = vector.broadcast %21 : vector<1x128xf32> to vector<128x128xf32>
    %23 = arith.subf %19, %22 : vector<128x128xf32>
    %24 = math.exp %23 : vector<128x128xf32>
    %25 = arith.truncf %24 : vector<128x128xf32> to vector<128x128xbf16>
    %cst_7 = arith.constant dense<0.000000e+00> : vector<65x128xf32>
    %26 = tpu.matmul %18, %25, %cst_7 {dimension_numbers = #tpu.dot_dimension_numbers<[1], [0], [0], [1], [0, 0, 1, 1], [], []>} : vector<65x128xbf16>, vector<128x128xbf16>, vector<65x128xf32> -> vector<65x128xf32>
    %27 = vector.extract_strided_slice %26 {offsets = [0, 0], sizes = [64, 128], strides = [1, 1]} : vector<65x128xf32> to vector<64x128xf32>
    %28 = vector.extract_strided_slice %26 {offsets = [64, 0], sizes = [1, 128], strides = [1, 1]} : vector<65x128xf32> to vector<1x128xf32>
    %29 = tpu.reciprocal %28 {approx = true} : vector<1x128xf32> -> vector<1x128xf32>
    %30 = vector.broadcast %0 : f32 to vector<1x128xf32>
    %31 = arith.mulf %30, %29 : vector<1x128xf32>
    %32 = vector.broadcast %31 : vector<1x128xf32> to vector<64x128xf32>
    %33 = arith.mulf %27, %32 : vector<64x128xf32>
    %34 = arith.index_cast %c0_i32_2 : i32 to index
    %c0_8 = arith.constant 0 : index
    %35 = arith.index_cast %5 : i32 to index
    %36 = vector.load %arg2[%34, %c0_8, %35] : memref<1x64x128xf32, #tpu.memory_space<vmem>>, vector<1x64x128xf32>
    %37 = vector.shape_cast %36 : vector<1x64x128xf32> to vector<64x128xf32>
    %38 = arith.addf %33, %37 : vector<64x128xf32>
    %39 = arith.index_cast %c0_i32_2 : i32 to index
    %c0_9 = arith.constant 0 : index
    %c0_10 = arith.constant 0 : index
    %40 = vector.load %arg6[%39, %c0_9, %c0_10] : memref<1x64x128xf32, #tpu.memory_space<vmem>>, vector<1x64x128xf32>
    %41 = vector.shape_cast %40 : vector<1x64x128xf32> to vector<64x128xf32>
    %42 = vector.shape_cast %38 : vector<64x128xf32> to vector<1x64x128xf32>
    tpu.vector_store %arg6[%39, %c0_9, %c0_10], %42 {strides = array<i32>} : memref<1x64x128xf32, #tpu.memory_space<vmem>>, vector<1x64x128xf32>,
    %c1_i32 = arith.constant 1 : i32
    return
  }
  func.func @transform_0(%arg0: i32, %arg1: i32) -> (i32, i32, i32) {
    %c0_i32 = arith.constant 0 : i32
    %c0_i32_0 = arith.constant 0 : i32
    %c0_i32_1 = arith.constant 0 : i32
    return %arg0, %c0_i32, %c0_i32_0 : i32, i32, i32
  }
  func.func @transform_1(%arg0: i32, %arg1: i32) -> (i32, i32) {
    %c0_i32 = arith.constant 0 : i32
    %c0_i32_0 = arith.constant 0 : i32
    %c0_i32_1 = arith.constant 0 : i32
    return %c0_i32, %c0_i32_0 : i32, i32
  }
  func.func @transform_2(%arg0: i32, %arg1: i32) -> (i32, i32) {
    %c0_i32 = arith.constant 0 : i32
    %c0_i32_0 = arith.constant 0 : i32
    %c0_i32_1 = arith.constant 0 : i32
    return %c0_i32, %c0_i32_0 : i32, i32
  }
  func.func @transform_3(%arg0: i32, %arg1: i32) -> (i32, i32) {
    %c0_i32 = arith.constant 0 : i32
    %c0_i32_0 = arith.constant 0 : i32
    %c0_i32_1 = arith.constant 0 : i32
    return %c0_i32, %c0_i32_0 : i32, i32
  }
  func.func @transform_4(%arg0: i32, %arg1: i32) -> (i32, i32, i32) {
    %c0_i32 = arith.constant 0 : i32
    %c0_i32_0 = arith.constant 0 : i32
    return %arg0, %c0_i32, %arg1 : i32, i32, i32
  }
}

</mosaic_0001>

<bundles_post_ra>
// kernel: tpu_custom_call.1
= control target key start
LH: loop header
LB: loop body
LE: loop exit
PB: predicated region body
PF: predicated region fallthrough
CT: control target
= control target key end

     0   :  { %s1300_s0 = inlined_call_operand.vmem [shape: f32[2,64,128], index: 0, kind: input, shape index: {}]   ;;  %s1301_s1 = inlined_call_operand.vmem [shape: bf16[80,64], index: 1, kind: input, shape index: {}]   ;;  %s1302_s2 = inlined_call_operand.vmem [shape: f32[80,1], index: 2, kind: input, shape index: {}]   ;;  %s1303_s3 = inlined_call_operand.<no memory space> [shape: f32[1,1], index: 3, kind: input, shape index: {}]   ;;  %s1304_s4 = inlined_call_operand.hbm [shape: f32[2,64,128], index: 4, kind: output, shape index: {}]  }
   0x1   :  { %9 = sst [smem:[#allocation3]] %s1303_s3 }
   0x2   :  { %10 = vsyncpa [#allocation5], 0 }
   0x3   :  { %12 = vsyncpa [#allocation5 + $0x1], 0  ;;  %s1009_s17 = smov 0   ;;  %s1011_s18 = smov 0  }
   0x4   :  { %s1013_s19 = smov 0   ;;  %s1015_s20 = smov 0  }
   0x5   :  { %s1017_s21 = smov 0   ;;  %s1019_s22 = smov 0  }
   0x6 LB: > { %s739_s3 = sadd.s32 4294967295, %s975_s22   ;;  %s740_s23 = sadd.s32 4294967294, %s975_s22   ;;  %s975_s22 = sphi %s1019_s22, %s18_s22   ;;  %s971_s21 = sphi %s1017_s21, %s1311_s21   ;;  %s967_s20 = sphi %s1015_s20, %s1310_s20   ;;  %s963_s19 = sphi %s1013_s19, %s1309_s19   ;;  %s959_s18 = sphi %s1011_s18, %s1308_s18   ;;  %s955_s17 = sphi %s1009_s17, %s1307_s17  }
   0x7   : > { %s30_s24 = sadd.s32 1, %s971_s21  ;;  %s128_s25 = sadd.s32 1, %s963_s19 }
   0x8   : > { %p32_p0 = scmp.ge.s32.totalorder %s30_s24, 2  ;;  %p138_p1 = scmp.ne.s32.totalorder %s963_s19, %s959_s18 }
   0x9   : > { %p139_p2 = scmp.eq.s32.totalorder %s739_s3, 1  ;;  %p144_p3 = scmp.ne.s32.totalorder %s959_s18, %s955_s17 }
   0xa   : > { %s1313_s24 = smov (%p32_p0, %s30_s24), 0  ;;  %p145_p5 = scmp.eq.s32.totalorder %s740_s23, 1 }
   0xb   : > { %p1049_p4 = por %p139_p2, %p138_p1  ;;  %s123_s27 = ssub.s32 %s971_s21, %s1313_s24 }
   0xc   : > { %p743_p6 = scmp.ge.s32.totalorder %s975_s22, 1  ;;  %p126_p7 = scmp.eq.s32.totalorder %s123_s27, 0 }
   0xd   : > { %p1056_p8 = por %p145_p5, %p144_p3  ;;  %p180_p9 = scmp.lt.s32.totalorder %s975_s22, 3 }
   0xe   : > { %s1062_s29 = scalar_select %p126_p7, %s963_s19, %s128_s25  }
   0xf   : > { %p181_p10 = pnand %p743_p6, %p180_p9 }
  0x10   : > { %p206_p11 = scmp.lt.s32.totalorder (!%p181_p10), %s967_s20, 1  ;;  %s212_s5 = sld [smem:[#allocation3]] (!%p181_p10) }
  0x11   : > { %184 = sbr.rel (%p181_p10) target bundleno = 858 (0x35a), region = 36  ;;  %s791_s9 = sshll.u32 (!%p181_p10), %s967_s20, 6 }
  0x12   : > { %s661_s12 = scalar_lea.hbm (!%p181_p10), %s1304_s4, %s791_s9  ;;  %s917_s25 = scalar_lea.hbm (!%p181_p10), %s1304_s4, 128 }
  0x13   : > { %s664_s14 = sshll.u32 (!%p181_p10), %s661_s12, 4  ;;  %s665_s14 = int_to_ptr.hbm [resolvable:$true] %s664_s14 }
  0x16   : > { %v227_v0 = vld [vmem:[%s1302_s2] sm:$0xff]  ;;  %v977_v1 = vmov 0   ;;  %s207_s6 = scalar_select %p206_p11, %s967_s20, 1  ;;  %v228_v6 = vld [vmem:[%s1302_s2 + $0x8] sm:$0xff]  ;;  %vm324_vm0 = vcmask 523264   ;;  %v234_v17 = vld [vmem:[%s1302_s2 + $0x38] sm:$0xff] }
  0x17   : > { %860 = vset.pattern.permute.xlu0 %v977_v1  ;;  %862 = vset.pattern.permute.xlu2 %v977_v1  ;;  %v232_v14 = vld [vmem:[%s1302_s2 + $0x28] sm:$0xff]  ;;  %v786_v16 = vld [vmem:[%s1301_s1] sm:$0xff]  ;;  %v788_v20 = vld [vmem:[%s1301_s1 + $0x10] sm:$0xff]  ;;  %vm448_vm1 = vcmask 1043456   ;;  %vm423_vm2 = vcmask 64512   ;;  %s911_s20 = sshra.s32 %s665_s14, 4  ;;  %s912_s20 = int_to_ptr.hbm [resolvable:$true] %s911_s20 }
  0x18   : > { %239 = vperm.xlu0 %860, %v227_v0   ;;  %s785_s7 = sshll.u32 %s207_s6, 6  ;;  %v236_v18 = vld [vmem:[%s1302_s2 + $0x48] sm:$0xff]  ;;  %v230_v21 = vld [vmem:[%s1302_s2 + $0x18] sm:$0xff]  ;;  %v231_v22 = vld [vmem:[%s1302_s2 + $0x20] sm:$0xff]  ;;  %s203_s6 = sand.u32 1, %s959_s18  }
  0x19   : > { %s210_s10 = scalar_lea.vmem %s1300_s0, %s785_s7  ;;  %v787_v19 = vld [vmem:[%s1301_s1 + $0x8] sm:$0xff]  ;;  %254 = vperm.xlu2 %862, %v230_v21   ;;  %v789_v23 = vld [vmem:[%s1301_s1 + $0x18] sm:$0xff]  ;;  %v233_v24 = vld [vmem:[%s1302_s2 + $0x30] sm:$0xff]  ;;  %s744_s7 = sshll.u32 %s203_s6, 6 }
  0x1a   : > { %v1074_v2 = vld [vmem:[%s210_s10 + $0x30] sm:$0xff]  ;;  %v1076_v3 = vld [vmem:[%s210_s10 + $0x38] sm:$0xff]  ;;  %v1078_v4 = vld [vmem:[%s210_s10 + $0x20] sm:$0xff]  ;;  %s1245_s8 = scalar_lea.vmem [#allocation4], %s744_s7  ;;  %s649_s15 = scalar_lea.sflag [#allocation5], %s203_s6 }
  0x1b   : > { %v298_v5 = vpack.c.bf16 %v1076_v3, %v1074_v2  ;;  %v1085_v7 = vld [vmem:[%s210_s10 + $0x28] sm:$0xff]  ;;  %v1089_v9 = vld [vmem:[%s210_s10 + $0x10] sm:$0xff]  ;;  %v1091_v10 = vld [vmem:[%s210_s10 + $0x18] sm:$0xff]  ;;  %s662_s13 = sshll.u32 %s1245_s8, 4  ;;  %s913_s16 = scalar_lea.hbm %s912_s20, 64  ;;  %s663_s13 = int_to_ptr.vmem [resolvable:$true] %s662_s13 }
  0x1c   : > { %v297_v8 = vpack.c.bf16 %v1085_v7, %v1078_v4  ;;  %v296_v11 = vpack.c.bf16 %v1091_v10, %v1089_v9  ;;  %v1095_v12 = vld [vmem:[%s210_s10] sm:$0xff]  ;;  %v1097_v13 = vld [vmem:[%s210_s10 + $0x8] sm:$0xff]  ;;  %p914_p12 = scmp.ne.s32.totalorder %s912_s20, %s913_s16  ;;  %p918_p1 = scmp.lt.s32.totalorder %s912_s20, %s1304_s4 }
  0x1d   : > { %344 = vmatpush.bf16.msra.mxu0 %v298_v5  ;;  %v295_v15 = vpack.c.bf16 %v1097_v13, %v1095_v12  ;;  %v790_v25 = vld [vmem:[%s1301_s1 + $0x20] sm:$0xff]  ;;  %p919_p2 = scmp.lt.s32.totalorder %s917_s25, %s913_s16 }
  0x1e   : > { %v235_v26 = vld [vmem:[%s1302_s2 + $0x40] sm:$0xff]  ;;  %p915_p13 = pnand %p914_p12, %p1049_p4 }
  0x1f   : > { %p920_p3 = por %p919_p2, %p918_p1 }
  0x20   : > { %244 = vperm.xlu0 %860, %v228_v6   ;;  %p916_p0 = pneg %p915_p13 }
  0x21   : > { %345 = vmatpush.bf16.msra.mxu0 %v297_v8  ;;  %259 = vperm.xlu2 %862, %v231_v22  }
  0x22   : > { %p921_p5 = pnand %p920_p3, %p916_p0 }
  0x25   : > { %346 = vmatpush.bf16.msra.mxu0 %v296_v11 }
  0x28   : > { %264 = vperm.xlu0 %860, %v232_v14   ;;  %v229_v14 = vld [vmem:[%s1302_s2 + $0x10] sm:$0xff] }
  0x29   : > { %347 = vmatpush.bf16.msra.mxu0 %v295_v15  ;;  %269 = vperm.xlu2 %862, %v233_v24  }
  0x2c   : > { %767 = vmatmul.msk.bf16.vlgmr.msra.gmra.mxu0 %vm324_vm0, %v786_v16 }
  0x30   : > { %274 = vperm.xlu0 %860, %v234_v17  }
  0x31   : > { %279 = vperm.xlu2 %862, %v235_v26  }
  0x38   : > { %284 = vperm.xlu0 %860, %v236_v18  }
  0x3c   : > { %768 = vmatmul.msk.bf16.gmra.mxu0 %vm324_vm0, %v787_v19 }
  0x4c   : > { %769 = vmatmul.msk.bf16.gmra.mxu0 %vm324_vm0, %v788_v20 }
  0x5c   : > { %770 = vmatmul.msk.bf16.gmra.mxu0 %vm324_vm0, %v789_v23 }
  0x6c   : > { %771 = vmatmul.msk.bf16.gmra.mxu0 %vm324_vm0, %v790_v25 }
  0x73   : > { %v255_v37 = vpop.permute.xlu2 %254 }
  0x7b   : > { %v260_v40 = vpop.permute.xlu2 %259 }
  0x83   : > { %v270_v47 = vpop.permute.xlu2 %269 }
  0x8a   : > { %v240_v27 = vpop.permute.xlu0 %239 }
  0x8b   : > { %v280_v54 = vpop.permute.xlu2 %279 }
  0x92   : > { %v245_v31 = vpop.permute.xlu0 %244 }
  0x9a   : > { %v265_v43 = vpop.permute.xlu0 %264 }
  0xa2   : > { %v275_v50 = vpop.permute.xlu0 %274 }
  0xa9   : > { %v349_v28 = vpop.f32.mrf.mxu0 }
  0xaa   : > { %v350_v29 = vadd.f32 %v349_v28, %v240_v27  ;;  %v285_v57 = vpop.permute.xlu0 %284 }
  0xac   : > { %v387_v30 = vpack.c.bf16 %v350_v29, %v350_v29 }
  0xae   : > { %407 = vxpose.xlu1.c.b16.start.end [1/1] (short) %v387_v30, 128 }
  0xb1   : > { %v351_v32 = vpop.f32.mrf.mxu0 }
  0xb2   : > { %v352_v33 = vadd.f32 %v351_v32, %v245_v31 }
  0xb4   : > { %v392_v34 = vpack.c.bf16 %v352_v33, %v352_v33 }
  0xb6   : > { %v450_v35 = vsel %vm448_vm1, %v392_v34, 0 }
  0xb7   : > { %459 = vmatpush.bf16.msra.mxu1 %v450_v35  ;;  %792 = vmatpush.bf16.msra.mxu3 %v450_v35 }
  0xb9   : > { %v1142_v36 = vpop.f32.mrf.mxu0 }
  0xc1   : > { %v356_v38 = vpop.f32.mrf.mxu0 }
  0xc2   : > { %v1144_v39 = vadd.f32 %v356_v38, %v255_v37 }
  0xc9   : > { %v359_v41 = vpop.f32.mrf.mxu0 }
  0xca   : > { %v1146_v42 = vadd.f32 %v359_v41, %v260_v40 }
  0xd1   : > { %v361_v44 = vpop.f32.mrf.mxu0 }
  0xd2   : > { %v1148_v45 = vadd.f32 %v361_v44, %v265_v43 }
  0xd4   : > { %v403_v46 = vpack.c.bf16 %v1148_v45, %v1146_v42 }
  0xd9   : > { %v364_v48 = vpop.f32.mrf.mxu0 }
  0xda   : > { %v1152_v49 = vadd.f32 %v364_v48, %v270_v47 }
  0xe1   : > { %v366_v51 = vpop.f32.mrf.mxu0 }
  0xe2   : > { %v1154_v52 = vadd.f32 %v366_v51, %v275_v50 }
  0xe4   : > { %v404_v53 = vpack.c.bf16 %v1154_v52, %v1152_v49 }
  0xe9   : > { %v369_v55 = vpop.f32.mrf.mxu0 }
  0xea   : > { %v1158_v56 = vadd.f32 %v369_v55, %v280_v54 }
  0xf1   : > { %v371_v58 = vpop.f32.mrf.mxu0 }
  0xf2   : > { %v1160_v59 = vadd.f32 %v371_v58, %v285_v57 }
  0xf4   : > { %v405_v60 = vpack.c.bf16 %v1160_v59, %v1158_v56 }
 0x101   : > { %861 = vset.pattern.permute.xlu1 %v977_v1 }
 0x15a   : > { %v415_v61 = vpop.trf.xlu1 }
 0x15b   : > { %772 = vmatmul.msk.bf16.vlgmr.msra.gmra.mxu1 %vm423_vm2, %v415_v61 }
 0x16a   : > { %v416_v62 = vpop.trf.xlu1 }
 0x16b   : > { %773 = vmatmul.msk.bf16.gmra.mxu1 %vm423_vm2, %v416_v62 }
 0x178   : > { %249 = vperm.xlu1 %861, %v229_v14  }
 0x17a   : > { %v417_v63 = vpop.trf.xlu1 }
 0x17b   : > { %774 = vmatmul.msk.bf16.gmra.mxu1 %vm423_vm2, %v417_v63 }
 0x18a   : > { %v418_v0 = vpop.trf.xlu1 }
 0x18b   : > { %775 = vmatmul.msk.bf16.gmra.mxu1 %vm423_vm2, %v418_v0 }
 0x19a   : > { %v419_v5 = vpop.trf.xlu1 }
 0x19b   : > { %776 = vmatmul.msk.bf16.gmra.mxu1 %vm423_vm2, %v419_v5 }
 0x1aa   : > { %v420_v6 = vpop.trf.xlu1 }
 0x1ab   : > { %777 = vmatmul.msk.bf16.gmra.mxu1 %vm423_vm2, %v420_v6 }
 0x1ba   : > { %v421_v1 = vpop.trf.xlu1 }
 0x1bb   : > { %778 = vmatmul.msk.bf16.vlgmr.msra.gmra.mxu3 %vm423_vm2, %v421_v1 }
 0x1ca   : > { %v422_v8 = vpop.trf.xlu1 }
 0x1cb   : > { %779 = vmatmul.msk.bf16.gmra.mxu3 %vm423_vm2, %v422_v8 }
 0x1d8   : > { %v1173_v11 = vpop.f32.mrf.mxu1 }
 0x1e0   : > { %v1178_v15 = vpop.f32.mrf.mxu1 }
 0x1e8   : > { %v1180_v16 = vpop.f32.mrf.mxu1 }
 0x1ea   : > { %v250_v55 = vpop.permute.xlu1 %249 }
 0x1eb   : > { %v1201_v57 = vadd.f32 %v1142_v36, %v250_v55 }
 0x1f0   : > { %v1182_v17 = vpop.f32.mrf.mxu1 }
 0x1f8   : > { %v1184_v18 = vpop.f32.mrf.mxu1 }
 0x1f9   : > { %v501_v30 = vmax.f32 %v1173_v11, %v1184_v18 }
 0x200   : > { %v1186_v19 = vpop.f32.mrf.mxu1 }
 0x201   : > { %v502_v28 = vmax.f32 %v1178_v15, %v1186_v19 }
 0x208   : > { %v1188_v20 = vpop.f32.mrf.mxu1 }
 0x209   : > { %v503_v31 = vmax.f32 %v1180_v16, %v1188_v20 }
 0x210   : > { %v1190_v21 = vpop.f32.mrf.mxu1 }
 0x211   : > { %v504_v32 = vmax.f32 %v1182_v17, %v1190_v21 }
 0x218   : > { %v481_v22 = vpop.f32.mrf.mxu1 }
 0x219   : > { %v505_v34 = vmax.f32 %v501_v30, %v481_v22 }
 0x220   : > { %v483_v23 = vpop.f32.mrf.mxu1 }
 0x221   : > { %v506_v33 = vmax.f32 %v502_v28, %v483_v23 }
 0x228   : > { %v486_v26 = vpop.f32.mrf.mxu1 }
 0x229   : > { %v507_v35 = vmax.f32 %v503_v31, %v486_v26 }
 0x230   : > { %v488_v29 = vpop.f32.mrf.mxu1 }
 0x231   : > { %v508_v37 = vmax.f32 %v504_v32, %v488_v29 }
 0x23e   : > { %v491_v24 = vpop.f32.mrf.mxu3 }
 0x23f   : > { %v509_v41 = vmax.f32 %v505_v34, %v491_v24 }
 0x246   : > { %v493_v25 = vpop.f32.mrf.mxu3 }
 0x247   : > { %v510_v38 = vmax.f32 %v506_v33, %v493_v25 }
 0x249   : > { %v513_v47 = vmax.f32 %v509_v41, %v510_v38 }
 0x24e   : > { %v496_v27 = vpop.f32.mrf.mxu3 }
 0x24f   : > { %v511_v43 = vmax.f32 %v507_v35, %v496_v27 }
 0x256   : > { %v498_v40 = vpop.f32.mrf.mxu3 }
 0x257   : > { %v512_v44 = vmax.f32 %v508_v37, %v498_v40 }
 0x259   : > { %v514_v48 = vmax.f32 %v511_v43, %v512_v44  ;;  %v978_v43 = vmov 1.0  }
 0x25a   : > { %384 = vst [vmem:[#allocation2 + $0x38] sm:$0x1] %v978_v43 }
 0x25b   : > { %v515_v50 = vmax.f32 %v513_v47, %v514_v48 }
 0x25d   : > { %v516_v51 = vrot.slane %v515_v50, 4 }
 0x25f   : > { %v517_v54 = vmax.f32 %v515_v50, %v516_v51 }
 0x261   : > { %v518_v58 = vrot.slane %v517_v54, 2 }
 0x263   : > { %v519_v61 = vmax.f32 %v517_v54, %v518_v58 }
 0x265   : > { %v520_v62 = vrot.slane %v519_v61, 1 }
 0x267   : > { %v1203_v63 = vmax.f32 %v519_v61, %v520_v62 }
 0x269   : > { %v537_v0 = vsub.f32 %v498_v40, %v1203_v63  ;;  %v536_v5 = vsub.f32 %v496_v27, %v1203_v63  ;;  %v534_v6 = vsub.f32 %v491_v24, %v1203_v63  ;;  %v535_v1 = vsub.f32 %v493_v25, %v1203_v63 }
 0x26a   : > { %v532_v30 = vsub.f32 %v486_v26, %v1203_v63  ;;  %v533_v31 = vsub.f32 %v488_v29, %v1203_v63  ;;  %v530_v33 = vsub.f32 %v481_v22, %v1203_v63  ;;  %v531_v24 = vsub.f32 %v483_v23, %v1203_v63 }
 0x26b   : > { %v568_v8 = vmul.f32 1.442695, %v537_v0  ;;  %v566_v14 = vmul.f32 1.442695, %v536_v5  ;;  %v562_v28 = vmul.f32 1.442695, %v534_v6  ;;  %v528_v35 = vsub.f32 %v1188_v20, %v1203_v63 }
 0x26c   : > { %v564_v36 = vmul.f32 1.442695, %v535_v1  ;;  %v558_v32 = vmul.f32 1.442695, %v532_v30  ;;  %v560_v27 = vmul.f32 1.442695, %v533_v31  ;;  %v529_v29 = vsub.f32 %v1190_v21, %v1203_v63 }
 0x26d   : > { %863 = vpow2.f32 %v568_v8  ;;  %v554_v25 = vmul.f32 1.442695, %v530_v33  ;;  %v556_v37 = vmul.f32 1.442695, %v531_v24  ;;  %v550_v22 = vmul.f32 1.442695, %v528_v35 }
 0x26e   : > { %865 = vpow2.f32 %v566_v14  ;;  %v526_v23 = vsub.f32 %v1184_v18, %v1203_v63  ;;  %v552_v20 = vmul.f32 1.442695, %v529_v29  ;;  %v527_v44 = vsub.f32 %v1186_v19, %v1203_v63  ;;  %v401_v33 = vld [vmem:[#allocation2 + $0x38] sm:$0x1] }
 0x26f   : > { %867 = vpow2.f32 %v562_v28  ;;  %v524_v51 = vsub.f32 %v1180_v16, %v1203_v63  ;;  %v525_v18 = vsub.f32 %v1182_v17, %v1203_v63  ;;  %v522_v62 = vsub.f32 %v1173_v11, %v1203_v63 }
 0x270   : > { %869 = vpow2.f32 %v564_v36  ;;  %v546_v50 = vmul.f32 1.442695, %v526_v23  ;;  %v548_v54 = vmul.f32 1.442695, %v527_v44  ;;  %v523_v16 = vsub.f32 %v1178_v15, %v1203_v63 }
 0x271   : > { %871 = vpow2.f32 %v558_v32  ;;  %v542_v19 = vmul.f32 1.442695, %v524_v51  ;;  %v544_v0 = vmul.f32 1.442695, %v525_v18  ;;  %v538_v17 = vmul.f32 1.442695, %v522_v62 }
 0x272   : > { %873 = vpow2.f32 %v560_v27  ;;  %v540_v8 = vmul.f32 1.442695, %v523_v16  ;;  %v406_v24 = vpack.c.bf16 %v401_v33, %v401_v33 }
 0x273   : > { %v864_v34 = vpop.eup %863  ;;  %875 = vpow2.f32 %v554_v25 }
 0x274   : > { %v866_v26 = vpop.eup %865  ;;  %877 = vpow2.f32 %v556_v37 }
 0x275   : > { %v868_v38 = vpop.eup %867  ;;  %v577_v40 = vpack.c.bf16 %v864_v34, %v866_v26  ;;  %879 = vpow2.f32 %v550_v22  ;;  %v402_v34 = vpack.c.bf16 %v1144_v39, %v1201_v57  ;;  %v612_v39 = vstv %s212_s5 }
 0x276   : > { %v870_v41 = vpop.eup %869  ;;  %881 = vpow2.f32 %v552_v20 }
 0x277   : > { %578 = vmatpush.bf16.msra.mxu2 %v577_v40  ;;  %793 = vmatpush.bf16.msrb.mxu3 %v577_v40  ;;  %v872_v47 = vpop.eup %871  ;;  %v576_v48 = vpack.c.bf16 %v870_v41, %v868_v38  ;;  %883 = vpow2.f32 %v546_v50 }
 0x278   : > { %v874_v21 = vpop.eup %873  ;;  %885 = vpow2.f32 %v548_v54 }
 0x279   : > { %v876_v55 = vpop.eup %875  ;;  %v575_v58 = vpack.c.bf16 %v874_v21, %v872_v47  ;;  %887 = vpow2.f32 %v542_v19 }
 0x27a   : > { %v878_v61 = vpop.eup %877  ;;  %889 = vpow2.f32 %v544_v0 }
 0x27b   : > { %579 = vmatpush.bf16.msra.mxu2 %v576_v48  ;;  %794 = vmatpush.bf16.msrb.mxu3 %v576_v48  ;;  %v880_v5 = vpop.eup %879  ;;  %v574_v6 = vpack.c.bf16 %v878_v61, %v876_v55  ;;  %891 = vpow2.f32 %v538_v17 }
 0x27c   : > { %v882_v1 = vpop.eup %881  ;;  %893 = vpow2.f32 %v540_v8 }
 0x27d   : > { %v884_v14 = vpop.eup %883  ;;  %v573_v28 = vpack.c.bf16 %v882_v1, %v880_v5 }
 0x27e   : > { %v886_v30 = vpop.eup %885 }
 0x27f   : > { %580 = vmatpush.bf16.msra.mxu2 %v575_v58  ;;  %795 = vmatpush.bf16.msrb.mxu3 %v575_v58  ;;  %v888_v11 = vpop.eup %887  ;;  %v572_v36 = vpack.c.bf16 %v886_v30, %v884_v14 }
 0x280   : > { %v890_v31 = vpop.eup %889 }
 0x281   : > { %v892_v15 = vpop.eup %891  ;;  %v571_v63 = vpack.c.bf16 %v890_v31, %v888_v11 }
 0x282   : > { %v894_v32 = vpop.eup %893 }
 0x283   : > { %581 = vmatpush.bf16.msra.mxu2 %v574_v6  ;;  %796 = vmatpush.bf16.msrb.mxu3 %v574_v6  ;;  %v570_v27 = vpack.c.bf16 %v894_v32, %v892_v15 }
 0x287   : > { %582 = vmatpush.bf16.msra.mxu2 %v573_v28  ;;  %797 = vmatpush.bf16.msrb.mxu3 %v573_v28 }
 0x28b   : > { %583 = vmatpush.bf16.msra.mxu2 %v572_v36  ;;  %798 = vmatpush.bf16.msrb.mxu3 %v572_v36 }
 0x28f   : > { %584 = vmatpush.bf16.msra.mxu2 %v571_v63  ;;  %799 = vmatpush.bf16.msrb.mxu3 %v571_v63 }
 0x293   : > { %585 = vmatpush.bf16.msra.mxu2 %v570_v27  ;;  %800 = vmatpush.bf16.msrb.mxu3 %v570_v27 }
 0x296   : > { %586 = vmatmul.bf16.vlgmr.msra.gmra.mxu2 %v402_v34  ;;  %606 = vmatmul.bf16.vlgmr.msrb.gmra.mxu3 %v406_v24 }
 0x2a6   : > { %591 = vmatmul.bf16.gmra.mxu2 %v403_v46 }
 0x2b6   : > { %596 = vmatmul.bf16.gmra.mxu2 %v404_v53 }
 0x2c6   : > { %601 = vmatmul.bf16.gmra.mxu2 %v405_v60 }
 0x319   : > { %v587_v25 = vpop.f32.mrf.mxu2  ;;  %v607_v35 = vpop.f32.mrf.mxu3 }
 0x31a   : > { %895 = vrcp.f32 %v607_v35 }
 0x320   : > { %v896_v57 = vpop.eup %895 }
 0x321   : > { %v613_v26 = vmul.f32 %v896_v57, %v612_v39  ;;  %v589_v37 = vpop.f32.mrf.mxu2  ;;  %v609_v29 = vpop.f32.mrf.mxu3 }
 0x323   : > { %v614_v42 = vperm.slane %v613_v26, 0 }
 0x325   : > { %v615_v45 = vmul.f32 %v614_v42, %v587_v25  ;;  %v616_v46 = vmul.f32 %v614_v42, %v589_v37 }
 0x327   : > { %v632_v49 = vadd.f32 %v615_v45, %v1095_v12  ;;  %v633_v52 = vadd.f32 %v616_v46, %v1097_v13 }
 0x329   : > { %641 = vst [vmem:[%s1245_s8 + $0x8] sm:$0xff] %v633_v52  ;;  %v592_v53 = vpop.f32.mrf.mxu2 }
 0x32a   : > { %640 = vst [vmem:[%s1245_s8] sm:$0xff] %v632_v49  ;;  %v617_v56 = vmul.f32 %v614_v42, %v592_v53 }
 0x32c   : > { %v634_v59 = vadd.f32 %v617_v56, %v1089_v9 }
 0x32e   : > { %642 = vst [vmem:[%s1245_s8 + $0x10] sm:$0xff] %v634_v59 }
 0x331   : > { %v594_v60 = vpop.f32.mrf.mxu2 }
 0x332   : > { %v618_v12 = vmul.f32 %v614_v42, %v594_v60 }
 0x334   : > { %v635_v13 = vadd.f32 %v618_v12, %v1091_v10 }
 0x336   : > { %643 = vst [vmem:[%s1245_s8 + $0x18] sm:$0xff] %v635_v13 }
 0x339   : > { %v597_v38 = vpop.f32.mrf.mxu2 }
 0x33a   : > { %v619_v40 = vmul.f32 %v614_v42, %v597_v38 }
 0x33c   : > { %v636_v41 = vadd.f32 %v619_v40, %v1078_v4 }
 0x33e   : > { %644 = vst [vmem:[%s1245_s8 + $0x20] sm:$0xff] %v636_v41 }
 0x341   : > { %v599_v22 = vpop.f32.mrf.mxu2 }
 0x342   : > { %v620_v23 = vmul.f32 %v614_v42, %v599_v22 }
 0x344   : > { %v637_v43 = vadd.f32 %v620_v23, %v1085_v7 }
 0x346   : > { %645 = vst [vmem:[%s1245_s8 + $0x28] sm:$0xff] %v637_v43 }
 0x349   : > { %v602_v9 = vpop.f32.mrf.mxu2 }
 0x34a   : > { %v621_v20 = vmul.f32 %v614_v42, %v602_v9 }
 0x34c   : > { %v638_v44 = vadd.f32 %v621_v20, %v1074_v2 }
 0x34e   : > { %646 = vst [vmem:[%s1245_s8 + $0x30] sm:$0xff] %v638_v44 }
 0x351   : > { %v604_v4 = vpop.f32.mrf.mxu2 }
 0x352   : > { %v622_v10 = vmul.f32 %v614_v42, %v604_v4 }
 0x354   : > { %v639_v7 = vadd.f32 %v622_v10, %v1076_v3 }
 0x356   : > { %647 = vst [vmem:[%s1245_s8 + $0x38] sm:$0xff] %v639_v7 }
 0x357   : > { %924 = shalt.err (!%p921_p5)
}
 0x358   : > { %s979_s5 = smov 128   ;;  %s980_s6 = smov 8  }
 0x359   : > { %801 = dma.vmem_to_hbm [thread:$0]  (%p1049_p4), %s663_s13, 1024, %s665_s14, %s649_s15, %s979_s5, %s979_s5, %s980_s6  }
 0x35a PF: > { %p807_p6 = scmp.ge.s32.totalorder %s975_s22, 2  ;;  %s679_s7 = sand.u32 1, %s955_s17  }
 0x35b   : > { %s680_s8 = scalar_lea.sflag [#allocation5], %s679_s7 }
 0x35c   : > { %p804_p7 = pnand %p807_p6, %p1056_p8 }
 0x35e   : > { %p805_p9 = pneg %p804_p7 }
 0x360   : > { %950 = dma.done.wait (%p805_p9), %s680_s8, 1024  }
 0x361   : > { %952 = vsyncadd (%p805_p9), %s680_s8, 4294966272  ;;  %s18_s22 = sadd.s32 1, %s975_s22   ;;  %s1307_s17 = smov %s959_s18 }
 0x362   : > { %p15_p10 = scmp.ge.s32.totalorder %s18_s22, 4   ;;  %s1308_s18 = smov %s963_s19 }
 0x363   : > { %s1309_s19 = smov %s1062_s29  ;;  %s1310_s20 = smov %s971_s21 }
 0x364   : > { %s1311_s21 = smov %s1313_s24  ;;  %17 = sbr.rel (!%p15_p10) target bundleno = 6 (0x6), region = 77 }
 0x369   :  { %686 = vsyncpa [#allocation5], 1 }
 0x36a   :  { %688 = vsyncpa [#allocation5 + $0x1], 1 }

</bundles_post_ra>
